<compile_context>
chip_gen: v7x
topology: tpu7x:2x2x1
jax: 0.10.0
libtpu: 0.0.40
codegen_flags: <defaults>
</compile_context>

<pallas_src>
import numpy as np

import jax
import jax.numpy as jnp
from jax import lax
from jax.experimental import pallas as pl
from jax.experimental.pallas import tpu as pltpu


def upsample1d_kernel(x_ref, w_ref, b_ref, s_ref, o_ref):
    # x_ref: (C_in, Bb*T)        input tile, batch folded into the lane (N) axis
    # w_ref: (K*C_out, C_in)     tap-major weight, rows [k*C_out:(k+1)*C_out] = W[:, :, k].T
    # b_ref: (C_out, 1)          bias (f32)
    # s_ref: (K*T, T_out)        stacked per-tap scatter matrices (shift+interleave+halo)
    # o_ref: (Bb, C_out, T_out)  output tile, T_out = 2*T
    Bb, C_out, T_out = o_ref.shape
    KT = s_ref.shape[0]
    T = x_ref.shape[1] // Bb
    K = KT // T

    # One MXU matmul for all K taps and every batch element in the tile.  Operands stay
    # in their native (possibly bf16) dtype; accumulation is f32 via preferred_element_type.
    p = jnp.dot(w_ref[...], x_ref[...],
                preferred_element_type=jnp.float32)            # (K*C_out, Bb*T)
    p = p.astype(s_ref.dtype)        # native-rate operand for the scatter matmul

    s = s_ref[...]                                             # (K*T, T_out), VMEM-resident
    bias = jnp.broadcast_to(b_ref[...], (C_out, T_out))        # hoisted: one broadcast/step

    for bi in range(Bb):                                       # Bb is small & static
        # Lay this batch element's taps out along lanes (column k*T + m), matching the
        # rows of the stacked scatter matrix -> ONE (C_out, K*T) @ (K*T, T_out) matmul.
        p_b = jnp.concatenate(
            [p[k * C_out:(k + 1) * C_out, bi * T:(bi + 1) * T] for k in range(K)],
            axis=1)                                            # (C_out, K*T)
        acc = jnp.dot(p_b, s, preferred_element_type=jnp.float32)  # (C_out, T_out)
        o_ref[bi] = (acc + bias).astype(o_ref.dtype)


def upsample1d(x, w, b, *, batch_block=None):
    """PyTorch ConvTranspose1d(dim, dim, 4, stride=2, padding=1) forward.

    x: (B, C, T);  w: (C_in, C_out, K) in torch ConvTranspose1d layout;  b: (C_out,).
    Returns (B, C_out, 2*T).
    """
    B, C_in, T = x.shape
    C_in_w, C_out, K = w.shape
    assert C_in_w == C_in, "ConvTranspose1d weight layout is (C_in, C_out, K)"
    stride, pad = 2, 1
    T_out = (T - 1) * stride - 2 * pad + K                 # == 2*T for (4, 2, 1)

    # Tap-major weight in the input dtype (bf16 stays bf16 -> native MXU rate).
    w_all = jnp.transpose(w, (2, 1, 0)).reshape(K * C_out, C_in).astype(x.dtype)
    b2 = b.reshape(C_out, 1).astype(jnp.float32)

    # Stacked scatter matrix: S[k*T + m, t] = 1 iff t == stride*m - pad + k (out-of-range
    # taps dropped => the padding=1 halo).  Exact 0/1 values in any float dtype; stored in
    # x.dtype so the scatter matmul runs at native MXU rate.
    m_idx = np.arange(T)[:, None]
    t_idx = np.arange(T_out)[None, :]
    scat = np.stack([(t_idx == stride * m_idx - pad + k) for k in range(K)], axis=0)
    scat = jnp.asarray(scat.reshape(K * T, T_out), dtype=x.dtype)   # (K*T, T_out)

    # Fold batch into lanes (wrapper-side layout plumbing): one lane-dense weight matmul
    # per grid step instead of Bb tiny N=T matmuls.
    x_fold = jnp.transpose(x, (1, 0, 2)).reshape(C_in, B * T)

    if batch_block is None:
        # Single grid step by default: on 1-TC chips (v5e/v6e) extra steps only add
        # ~0.35us pipeline overhead each; on v7x pass batch_block = B // 2 once the
        # per-step work is large enough to make megacore sharding pay.
        batch_block = B
    assert B % batch_block == 0, "batch_block must divide the batch size"
    assert batch_block == B or (batch_block * T) % 128 == 0, \
        "sub-batch tiles must keep the folded lane width a multiple of 128"
    grid = (B // batch_block,)

    return pl.pallas_call(
        upsample1d_kernel,
        out_shape=jax.ShapeDtypeStruct((B, C_out, T_out), x.dtype),
        grid_spec=pltpu.PrefetchScalarGridSpec(
            num_scalar_prefetch=0,
            grid=grid,
            in_specs=[
                pl.BlockSpec((C_in, batch_block * T), lambda bi: (0, bi)),
                # Constants: constant index maps -> DMA'd once, stay resident in VMEM.
                pl.BlockSpec((K * C_out, C_in), lambda bi: (0, 0)),
                pl.BlockSpec((C_out, 1), lambda bi: (0, 0)),
                pl.BlockSpec((K * T, T_out), lambda bi: (0, 0)),
            ],
            out_specs=pl.BlockSpec((batch_block, C_out, T_out), lambda bi: (bi, 0, 0)),
        ),
        compiler_params=pltpu.CompilerParams(
            dimension_semantics=("parallel",)),
    )(x_fold, w_all, b2, scat)


def reference(x, w, b):
    """Plain-JAX reference matching torch ConvTranspose1d(dim, dim, 4, 2, 1)."""
    C_in, C_out, K = w.shape
    stride, pad = 2, 1
    w_conv = jnp.transpose(jnp.flip(w, axis=-1), (1, 0, 2))          # (C_out, C_in, K), 'OIH'
    y = lax.conv_general_dilated(
        x, w_conv, window_strides=(1,), padding=[(K - 1 - pad, K - 1 - pad)],
        lhs_dilation=(stride,), dimension_numbers=('NCH', 'OIH', 'NCH'))
    return y + b[None, :, None]


if __name__ == "__main__":
    # Small shapes consistent with the module: Upsample1d(dim=8) on a length-64 sequence.
    # dim=8 fills a sublane exactly; T=64 makes the output last dim 2*T = 128 (lane-dense)
    # and the collapsed scatter contraction K*T = 256 (full MXU depth on v6e/v7x).
    B, C, T, K = 2, 8, 64, 4

    key = jax.random.PRNGKey(0)
    kx, kw, kb = jax.random.split(key, 3)
    x = jax.random.normal(kx, (B, C, T), dtype=jnp.float32)

    # PyTorch-style init: U(-1/sqrt(fan_in), 1/sqrt(fan_in)).
    bound = 1.0 / (C * K) ** 0.5
    w = jax.random.uniform(kw, (C, C, K), jnp.float32, -bound, bound)   # (C_in, C_out, K)
    b = jax.random.uniform(kb, (C,), jnp.float32, -bound, bound)

    out = upsample1d(x, w, b)
    out = jax.block_until_ready(out)

    ref = reference(x, w, b)
    assert out.shape == (B, C, 2 * T)
    err = float(jnp.max(jnp.abs(out - ref)))
    assert err < 1e-3, f"mismatch vs reference: {err}"

    print("KERNEL_OK")
</pallas_src>

<mosaic_0001>
module attributes {stable_mosaic.version = 11 : i64} {
  func.func @upsample1d_kernel(%arg0: i32, %arg1: memref<8x128xf32, #tpu.memory_space<vmem>>, %arg2: memref<32x8xf32, #tpu.memory_space<vmem>>, %arg3: memref<8x1xf32, #tpu.memory_space<vmem>>, %arg4: memref<256x128xf32, #tpu.memory_space<vmem>>, %arg5: memref<2x8x128xf32, #tpu.memory_space<vmem>>) attributes {dimension_semantics = [#tpu.dimension_semantics<parallel>], iteration_bounds = array<i64: 1>, scalar_prefetch = 0 : i64, scratch_operands = 0 : i64, tpu.core_type = #tpu.core_type<tc>, window_params = [{transform_indices = @transform_0, window_bounds = array<i64: 8, 128>}, {pipeline_mode = #tpu.pipeline_mode<synchronous>, transform_indices = @transform_1, window_bounds = array<i64: 32, 8>}, {pipeline_mode = #tpu.pipeline_mode<synchronous>, transform_indices = @transform_2, window_bounds = array<i64: 8, 1>}, {pipeline_mode = #tpu.pipeline_mode<synchronous>, transform_indices = @transform_3, window_bounds = array<i64: 256, 128>}, {transform_indices = @transform_4, window_bounds = array<i64: 2, 8, 128>}]} {
    %c0 = arith.constant 0 : index
    %c0_0 = arith.constant 0 : index
    %0 = vector.load %arg2[%c0, %c0_0] : memref<32x8xf32, #tpu.memory_space<vmem>>, vector<32x8xf32>
    %c0_1 = arith.constant 0 : index
    %c0_2 = arith.constant 0 : index
    %1 = vector.load %arg1[%c0_1, %c0_2] : memref<8x128xf32, #tpu.memory_space<vmem>>, vector<8x128xf32>
    %cst = arith.constant dense<0.000000e+00> : vector<32x128xf32>
    %2 = tpu.matmul %0, %1, %cst {dimension_numbers = #tpu.dot_dimension_numbers<[1], [0], [0], [1], [0, 0, 1, 1], [], []>} : vector<32x8xf32>, vector<8x128xf32>, vector<32x128xf32> -> vector<32x128xf32>
    %c0_3 = arith.constant 0 : index
    %c0_4 = arith.constant 0 : index
    %3 = vector.load %arg4[%c0_3, %c0_4] : memref<256x128xf32, #tpu.memory_space<vmem>>, vector<256x128xf32>
    %c0_5 = arith.constant 0 : index
    %c0_6 = arith.constant 0 : index
    %4 = vector.load %arg3[%c0_5, %c0_6] : memref<8x1xf32, #tpu.memory_space<vmem>>, vector<8x1xf32>
    %5 = vector.shape_cast %4 : vector<8x1xf32> to vector<8x1xf32>
    %6 = vector.broadcast %5 : vector<8x1xf32> to vector<8x128xf32>
    %7 = vector.extract_strided_slice %2 {offsets = [0, 0], sizes = [8, 64], strides = [1, 1]} : vector<32x128xf32> to vector<8x64xf32>
    %8 = vector.extract_strided_slice %2 {offsets = [8, 0], sizes = [8, 64], strides = [1, 1]} : vector<32x128xf32> to vector<8x64xf32>
    %9 = vector.extract_strided_slice %2 {offsets = [16, 0], sizes = [8, 64], strides = [1, 1]} : vector<32x128xf32> to vector<8x64xf32>
    %10 = vector.extract_strided_slice %2 {offsets = [24, 0], sizes = [8, 64], strides = [1, 1]} : vector<32x128xf32> to vector<8x64xf32>
    %11 = tpu.concatenate %7, %8, %9, %10 in 1 : vector<8x64xf32>, vector<8x64xf32>, vector<8x64xf32>, vector<8x64xf32> -> vector<8x256xf32>
    %cst_7 = arith.constant dense<0.000000e+00> : vector<8x128xf32>
    %12 = tpu.matmul %11, %3, %cst_7 {dimension_numbers = #tpu.dot_dimension_numbers<[1], [0], [0], [1], [0, 0, 1, 1], [], []>} : vector<8x256xf32>, vector<256x128xf32>, vector<8x128xf32> -> vector<8x128xf32>
    %13 = arith.addf %12, %6 : vector<8x128xf32>
    %c0_8 = arith.constant 0 : index
    %c0_9 = arith.constant 0 : index
    %c0_10 = arith.constant 0 : index
    %14 = vector.load %arg5[%c0_8, %c0_9, %c0_10] : memref<2x8x128xf32, #tpu.memory_space<vmem>>, vector<1x8x128xf32>
    %15 = vector.shape_cast %14 : vector<1x8x128xf32> to vector<8x128xf32>
    %16 = vector.shape_cast %13 : vector<8x128xf32> to vector<1x8x128xf32>
    tpu.vector_store %arg5[%c0_8, %c0_9, %c0_10], %16 {strides = array<i32>} : memref<2x8x128xf32, #tpu.memory_space<vmem>>, vector<1x8x128xf32>,
    %17 = vector.extract_strided_slice %2 {offsets = [0, 64], sizes = [8, 64], strides = [1, 1]} : vector<32x128xf32> to vector<8x64xf32>
    %18 = vector.extract_strided_slice %2 {offsets = [8, 64], sizes = [8, 64], strides = [1, 1]} : vector<32x128xf32> to vector<8x64xf32>
    %19 = vector.extract_strided_slice %2 {offsets = [16, 64], sizes = [8, 64], strides = [1, 1]} : vector<32x128xf32> to vector<8x64xf32>
    %20 = vector.extract_strided_slice %2 {offsets = [24, 64], sizes = [8, 64], strides = [1, 1]} : vector<32x128xf32> to vector<8x64xf32>
    %21 = tpu.concatenate %17, %18, %19, %20 in 1 : vector<8x64xf32>, vector<8x64xf32>, vector<8x64xf32>, vector<8x64xf32> -> vector<8x256xf32>
    %cst_11 = arith.constant dense<0.000000e+00> : vector<8x128xf32>
    %22 = tpu.matmul %21, %3, %cst_11 {dimension_numbers = #tpu.dot_dimension_numbers<[1], [0], [0], [1], [0, 0, 1, 1], [], []>} : vector<8x256xf32>, vector<256x128xf32>, vector<8x128xf32> -> vector<8x128xf32>
    %23 = arith.addf %22, %6 : vector<8x128xf32>
    %c1 = arith.constant 1 : index
    %c0_12 = arith.constant 0 : index
    %c0_13 = arith.constant 0 : index
    %24 = vector.load %arg5[%c1, %c0_12, %c0_13] : memref<2x8x128xf32, #tpu.memory_space<vmem>>, vector<1x8x128xf32>
    %25 = vector.shape_cast %24 : vector<1x8x128xf32> to vector<8x128xf32>
    %26 = vector.shape_cast %23 : vector<8x128xf32> to vector<1x8x128xf32>
    tpu.vector_store %arg5[%c1, %c0_12, %c0_13], %26 {strides = array<i32>} : memref<2x8x128xf32, #tpu.memory_space<vmem>>, vector<1x8x128xf32>,
    return
  }
  func.func @transform_0(%arg0: i32) -> (i32, i32) {
    %c0_i32 = arith.constant 0 : i32
    %c0_i32_0 = arith.constant 0 : i32
    return %c0_i32, %arg0 : i32, i32
  }
  func.func @transform_1(%arg0: i32) -> (i32, i32) {
    %c0_i32 = arith.constant 0 : i32
    %c0_i32_0 = arith.constant 0 : i32
    %c0_i32_1 = arith.constant 0 : i32
    return %c0_i32, %c0_i32_0 : i32, i32
  }
  func.func @transform_2(%arg0: i32) -> (i32, i32) {
    %c0_i32 = arith.constant 0 : i32
    %c0_i32_0 = arith.constant 0 : i32
    %c0_i32_1 = arith.constant 0 : i32
    return %c0_i32, %c0_i32_0 : i32, i32
  }
  func.func @transform_3(%arg0: i32) -> (i32, i32) {
    %c0_i32 = arith.constant 0 : i32
    %c0_i32_0 = arith.constant 0 : i32
    %c0_i32_1 = arith.constant 0 : i32
    return %c0_i32, %c0_i32_0 : i32, i32
  }
  func.func @transform_4(%arg0: i32) -> (i32, i32, i32) {
    %c0_i32 = arith.constant 0 : i32
    %c0_i32_0 = arith.constant 0 : i32
    %c0_i32_1 = arith.constant 0 : i32
    return %arg0, %c0_i32, %c0_i32_0 : i32, i32, i32
  }
}

</mosaic_0001>

<bundles_post_ra>
// kernel: tpu_custom_call.1
= control target key start
LH: loop header
LB: loop body
LE: loop exit
PB: predicated region body
PF: predicated region fallthrough
CT: control target
= control target key end

     0   :  { %9 = vsyncpa [#allocation3], 0  ;;  %s650_s0 = inlined_call_operand.vmem [shape: f32[8,128], index: 0, kind: input, shape index: {}]   ;;  %s651_s1 = inlined_call_operand.vmem [shape: f32[32,8], index: 1, kind: input, shape index: {}]   ;;  %s652_s2 = inlined_call_operand.vmem [shape: f32[8,1], index: 2, kind: input, shape index: {}]   ;;  %s653_s3 = inlined_call_operand.hbm [shape: f32[256,128], index: 3, kind: input, shape index: {}]   ;;  %s654_s4 = inlined_call_operand.hbm [shape: f32[2,8,128], index: 4, kind: output, shape index: {}]  }
   0x1   :  { %10 = vsyncpa [#allocation4], 0  ;;  %s571_s15 = smov [#allocation2]   ;;  %s523_s19 = scalar_lea.hbm %s653_s3, 4096 }
   0x2   :  { %s22_s16 = sshll.u32 %s571_s15, 4  ;;  %p524_p0 = scmp.ne.s32.totalorder %s653_s3, %s523_s19  ;;  %s23_s16 = int_to_ptr.vmem [resolvable:$true] %s22_s16 }
   0x3   :  { %p527_p1 = scmp.lt.u32.totalorder %s523_s19, %s653_s3 }
   0x5   :  { %p529_p2 = pnand %p527_p1, %p524_p0 }
   0x7   :  { %532 = shalt.err (!%p529_p2)
}
   0x8   :  { %s533_s24 = scalar_lea.vmem %s23_s16, 4096  ;;  %p538_p4 = scmp.lt.s32.totalorder %s23_s16, %s23_s16 }
   0x9   :  { %p534_p3 = scmp.ne.s32.totalorder %s23_s16, %s533_s24  ;;  %p539_p5 = scmp.lt.s32.totalorder %s533_s24, %s533_s24 }
   0xb   :  { %p540_p6 = por %p539_p5, %p538_p4 }
   0xd   :  { %p541_p7 = pnand %p540_p6, %p534_p3 }
   0xf   :  { %544 = shalt.err (!%p541_p7)
}
  0x10   :  { %s572_s25 = smov 128   ;;  %s573_s26 = smov 8  }
  0x11   :  { %28 = dma.hbm_to_vmem [thread:$0]  %s653_s3, 4096, %s23_s16, [#allocation3], %s572_s25, %s572_s25, %s573_s26  }
  0x12   :  { %567 = dma.done.wait [#allocation3], 4096  }
  0x13   :  { %568 = vsyncadd [#allocation3], 4294963200  ;;  %vm37_vm0 = vcmask 64512   ;;  %v36_v0 = vld [vmem:[%s650_s0] sm:$0xff]  ;;  %v33_v2 = vld [vmem:[%s651_s1 + $0x8] sm:$0xff]  ;;  %v574_v57 = vmov 0  }
  0x14   :  { %v32_v1 = vld [vmem:[%s651_s1] sm:$0xff]  ;;  %433 = vmatprep.subr.mxu0 %v36_v0  ;;  %v34_v3 = vld [vmem:[%s651_s1 + $0x10] sm:$0xff]  ;;  %v35_v4 = vld [vmem:[%s651_s1 + $0x18] sm:$0xff]  ;;  %521 = vset.pattern.permute.xlu1 %v574_v57  ;;  %s575_s12 = smov 64   ;;  %vm181_vm1 = vcmask 523264  }
  0x15   :  { %435 = vmatprep.mubr.msk.f32.mxu0 %vm37_vm0, %v32_v1  ;;  %434 = vmatpush3.msra.mxu0 %v36_v0  ;;  %v151_v5 = vld [vmem:[#allocation2 + $0x80] sm:$0xff]  ;;  %v152_v6 = vld [vmem:[#allocation2 + $0x88] sm:$0xff]  ;;  %v153_v10 = vld [vmem:[#allocation2 + $0x90] sm:$0xff] }
  0x16   :  { %436 = vmatmul.mubr.msk.f32.vlgmr.msra.gmra.mrb[0].mxu0 %vm37_vm0, %v33_v2  ;;  %v135_v7 = vld [vmem:[#allocation2] sm:$0xff]  ;;  %v441_v8 = vpack.c.bf16 %v152_v6, %v151_v5  ;;  %v136_v9 = vld [vmem:[#allocation2 + $0x8] sm:$0xff]  ;;  %v154_v11 = vld [vmem:[#allocation2 + $0x98] sm:$0xff]  ;;  %522 = vset.pattern.permute.xlu0 %v574_v57 }
  0x17   :  { %438 = vmatprep.mubr.msk.f32.mxu0 %vm37_vm0, %v34_v3  ;;  %v443_v12 = vpack.c.bf16 %v136_v9, %v135_v7  ;;  %v445_v13 = vpack.c.bf16 %v154_v11, %v153_v10  ;;  %v137_v14 = vld [vmem:[#allocation2 + $0x10] sm:$0xff]  ;;  %v138_v15 = vld [vmem:[#allocation2 + $0x18] sm:$0xff]  ;;  %v155_v16 = vld [vmem:[#allocation2 + $0xa0] sm:$0xff] }
  0x18   :  { %442 = vmatprep.subr.bf16.mxu1 %v441_v8  ;;  %474 = vmatprep.subr.bf16.mxu0 %v441_v8  ;;  %v156_v17 = vld [vmem:[#allocation2 + $0xa8] sm:$0xff]  ;;  %v447_v18 = vpack.c.bf16 %v138_v15, %v137_v14  ;;  %v139_v20 = vld [vmem:[#allocation2 + $0x20] sm:$0xff]  ;;  %v157_v22 = vld [vmem:[#allocation2 + $0xb0] sm:$0xff] }
  0x19   :  { %444 = vmatpush3.bf16.msra.mxu1 %v443_v12  ;;  %476 = vmatpush3.bf16.msra.mxu0 %v443_v12  ;;  %v449_v19 = vpack.c.bf16 %v156_v17, %v155_v16  ;;  %v140_v21 = vld [vmem:[#allocation2 + $0x28] sm:$0xff]  ;;  %v158_v23 = vld [vmem:[#allocation2 + $0xb8] sm:$0xff]  ;;  %v141_v26 = vld [vmem:[#allocation2 + $0x30] sm:$0xff] }
  0x1a   :  { %439 = vmatmul.mubr.msk.f32.gmra.mrb[2].mxu0 %vm37_vm0, %v35_v4  ;;  %446 = vmatprep.subr.bf16.mxu1 %v445_v13  ;;  %v451_v24 = vpack.c.bf16 %v140_v21, %v139_v20  ;;  %v453_v25 = vpack.c.bf16 %v158_v23, %v157_v22  ;;  %v142_v27 = vld [vmem:[#allocation2 + $0x38] sm:$0xff]  ;;  %v159_v28 = vld [vmem:[#allocation2 + $0xc0] sm:$0xff]  ;;  %v160_v29 = vld [vmem:[#allocation2 + $0xc8] sm:$0xff] }
  0x1b   :  { %478 = vmatprep.subr.bf16.mxu0 %v445_v13  ;;  %v455_v30 = vpack.c.bf16 %v142_v27, %v141_v26  ;;  %v457_v31 = vpack.c.bf16 %v160_v29, %v159_v28  ;;  %v143_v32 = vld [vmem:[#allocation2 + $0x40] sm:$0xff]  ;;  %v144_v33 = vld [vmem:[#allocation2 + $0x48] sm:$0xff]  ;;  %v161_v34 = vld [vmem:[#allocation2 + $0xd0] sm:$0xff] }
  0x1c   :  { %v162_v35 = vld [vmem:[#allocation2 + $0xd8] sm:$0xff]  ;;  %v459_v36 = vpack.c.bf16 %v144_v33, %v143_v32  ;;  %v145_v38 = vld [vmem:[#allocation2 + $0x50] sm:$0xff]  ;;  %v163_v40 = vld [vmem:[#allocation2 + $0xe0] sm:$0xff] }
  0x1d   :  { %448 = vmatpush3.bf16.msra.mxu1 %v447_v18  ;;  %480 = vmatpush3.bf16.msra.mxu0 %v447_v18  ;;  %v461_v37 = vpack.c.bf16 %v162_v35, %v161_v34  ;;  %v146_v39 = vld [vmem:[#allocation2 + $0x58] sm:$0xff]  ;;  %v164_v41 = vld [vmem:[#allocation2 + $0xe8] sm:$0xff]  ;;  %v147_v44 = vld [vmem:[#allocation2 + $0x60] sm:$0xff] }
  0x1e   :  { %450 = vmatprep.subr.bf16.mxu1 %v449_v19  ;;  %482 = vmatprep.subr.bf16.mxu0 %v449_v19  ;;  %v463_v42 = vpack.c.bf16 %v146_v39, %v145_v38  ;;  %v465_v43 = vpack.c.bf16 %v164_v41, %v163_v40  ;;  %v148_v45 = vld [vmem:[#allocation2 + $0x68] sm:$0xff]  ;;  %v165_v47 = vld [vmem:[#allocation2 + $0xf0] sm:$0xff]  ;;  %v166_v48 = vld [vmem:[#allocation2 + $0xf8] sm:$0xff] }
  0x1f   :  { %v467_v46 = vpack.c.bf16 %v148_v45, %v147_v44  ;;  %v469_v49 = vpack.c.bf16 %v166_v48, %v165_v47  ;;  %v149_v50 = vld [vmem:[#allocation2 + $0x70] sm:$0xff]  ;;  %v150_v51 = vld [vmem:[#allocation2 + $0x78] sm:$0xff]  ;;  %v167_v56 = vld [vmem:[%s652_s2] sm:$0xff]  ;;  %s576_s2 = smov [#allocation5]  }
  0x20   :  { %v471_v52 = vpack.c.bf16 %v150_v51, %v149_v50  ;;  %170 = vperm.xlu1 %521, %v167_v56   ;;  %s342_s13 = sshll.u32 %s576_s2, 4  ;;  %s343_s13 = int_to_ptr.vmem [resolvable:$true] %s342_s13 }
  0x21   :  { %452 = vmatpush3.bf16.msra.mxu1 %v451_v24  ;;  %484 = vmatpush3.bf16.msra.mxu0 %v451_v24  ;;  %s545_s14 = scalar_lea.vmem %s343_s13, 256  ;;  %p550_p9 = scmp.lt.s32.totalorder %s343_s13, %s343_s13 }
  0x22   :  { %454 = vmatprep.subr.bf16.mxu1 %v453_v25  ;;  %486 = vmatprep.subr.bf16.mxu0 %v453_v25  ;;  %p546_p8 = scmp.ne.s32.totalorder %s343_s13, %s545_s14  ;;  %p551_p10 = scmp.lt.s32.totalorder %s545_s14, %s545_s14 }
  0x24   :  { %p552_p11 = por %p551_p10, %p550_p9 }
  0x25   :  { %456 = vmatpush3.bf16.msra.mxu1 %v455_v30  ;;  %488 = vmatpush3.bf16.msra.mxu0 %v455_v30 }
  0x26   :  { %458 = vmatprep.subr.bf16.mxu1 %v457_v31  ;;  %490 = vmatprep.subr.bf16.mxu0 %v457_v31  ;;  %p553_p12 = pnand %p552_p11, %p546_p8 }
  0x29   :  { %460 = vmatpush3.bf16.msra.mxu1 %v459_v36  ;;  %492 = vmatpush3.bf16.msra.mxu0 %v459_v36 }
  0x2a   :  { %462 = vmatprep.subr.bf16.mxu1 %v461_v37  ;;  %494 = vmatprep.subr.bf16.mxu0 %v461_v37 }
  0x2d   :  { %464 = vmatpush3.bf16.msra.mxu1 %v463_v42  ;;  %496 = vmatpush3.bf16.msra.mxu0 %v463_v42 }
  0x2e   :  { %466 = vmatprep.subr.bf16.mxu1 %v465_v43  ;;  %498 = vmatprep.subr.bf16.mxu0 %v465_v43 }
  0x31   :  { %468 = vmatpush3.bf16.msra.mxu1 %v467_v46  ;;  %500 = vmatpush3.bf16.msra.mxu0 %v467_v46 }
  0x32   :  { %470 = vmatprep.subr.bf16.mxu1 %v469_v49  ;;  %502 = vmatprep.subr.bf16.mxu0 %v469_v49 }
  0x35   :  { %472 = vmatpush3.bf16.msra.mxu1 %v471_v52  ;;  %504 = vmatpush3.bf16.msra.mxu0 %v471_v52 }
  0x9f   :  { %v171_v7 = vpop.permute.xlu1 %170 }
  0xe9   :  { %v437_v53 = vpop.f32.mrb[0].mxu0 }
  0xea   :  { %v116_v54 = vpop.f32.mrb[1].mxu0 }
  0xeb   :  { %v516_v55 = vpack.i.bf16 %v116_v54, %v437_v53 }
  0xed   :  { %v440_v58 = vpop.f32.mrb[2].mxu0 }
  0xee   :  { %v126_v59 = vpop.f32.mrb[3].mxu0 }
  0xef   :  { %v511_v60 = vpack.i.bf16 %v126_v59, %v440_v58 }
  0xf1   :  { %512 = vrot.lane.b32.xlu0 %v511_v60, %s575_s12 }
  0xf5   :  { %517 = vrot.lane.b32.xlu0 %v516_v55, %s575_s12 }
 0x163   :  { %v513_v61 = vpop.permute.xlu0 %512 }
 0x164   :  { %v515_v62 = vunpack.i.h.bf16 %v513_v61  ;;  %v514_v63 = vunpack.i.l.bf16 %v513_v61 }
 0x166   :  { %v183_v0 = vsel %vm181_vm1, %v126_v59, %v514_v63  ;;  %v264_v1 = vsel %vm181_vm1, %v515_v62, %v440_v58 }
 0x167   :  { %v518_v2 = vpop.permute.xlu0 %517  ;;  %248 = vmatprep.mubr.f32.mxu1 %v183_v0  ;;  %329 = vmatprep.mubr.f32.mxu0 %v264_v1 }
 0x168   :  { %v520_v3 = vunpack.i.h.bf16 %v518_v2  ;;  %v519_v4 = vunpack.i.l.bf16 %v518_v2 }
 0x16a   :  { %v182_v5 = vsel %vm181_vm1, %v116_v54, %v519_v4  ;;  %v263_v6 = vsel %vm181_vm1, %v520_v3, %v437_v53 }
 0x16b   :  { %249 = vmatmul.mubr.f32.vlgmr.msra.gmra.mrb[0].mxu1 %v182_v5  ;;  %330 = vmatmul.mubr.f32.vlgmr.msra.gmra.mrb[4].mxu0 %v263_v6 }
 0x23e   :  { %v395_v8 = vpop.f32.mrb[0].mxu1  ;;  %v430_v9 = vpop.f32.mrb[4].mxu0 }
 0x23f   :  { %v396_v10 = vpop.f32.mrb[1].mxu1  ;;  %v431_v11 = vpop.f32.mrb[5].mxu0 }
 0x240   :  { %v397_v12 = vadd.f32 %v396_v10, %v395_v8  ;;  %v432_v13 = vadd.f32 %v431_v11, %v430_v9 }
 0x242   :  { %v251_v14 = vadd.f32 %v397_v12, %v171_v7  ;;  %v332_v15 = vadd.f32 %v432_v13, %v171_v7 }
 0x244   :  { %254 = vst [vmem:[#allocation5] sm:$0xff] %v251_v14  ;;  %336 = vst [vmem:[#allocation5 + $0x8] sm:$0xff] %v332_v15 }
 0x245   :  { %556 = shalt.err (!%p553_p12)
}
 0x246   :  { %s557_s17 = scalar_lea.hbm %s654_s4, 256 }
 0x247   :  { %p558_p13 = scmp.ne.s32.totalorder %s654_s4, %s557_s17  ;;  %p561_p0 = scmp.lt.u32.totalorder %s557_s17, %s654_s4 }
 0x249   :  { %p563_p1 = pnand %p561_p0, %p558_p13 }
 0x24b   :  { %566 = shalt.err (!%p563_p1)
}
 0x24c   :  { %348 = dma.vmem_to_hbm [thread:$0]  %s343_s13, 256, %s654_s4, [#allocation4], %s572_s25, %s572_s25, %s573_s26  }
 0x24d   :  { %569 = dma.done.wait [#allocation4], 256  }
 0x24e   :  { %570 = vsyncadd [#allocation4], 4294967040 }
 0x24f   :  { %352 = vsyncpa [#allocation3], 1 }
 0x250   :  { %353 = vsyncpa [#allocation4], 1 }

</bundles_post_ra>
